<compile_context>
chip_gen: v7x
topology: tpu7x:2x2x1
jax: 0.10.0
libtpu: 0.0.40
codegen_flags: <defaults>
</compile_context>

<pallas_src>
import jax
import jax.numpy as jnp
from jax.experimental import pallas as pl
from jax.experimental.pallas import tpu as pltpu


def _round_up(x, m):
    return (x + m - 1) // m * m


def _vmem_limit(nbytes):
    # generous slack over the raw estimate, clamped to a sane range
    return int(min(max(nbytes + nbytes // 2 + (2 << 20), 16 << 20), 100 << 20))


# --------------------------------------------------------------------------- #
# Kernel 1: attention logits   s[m] = h[m, :] . linear_in(query)
# --------------------------------------------------------------------------- #
def _score_kernel(qin_ref, h_ref, s_ref):
    # qin_ref: (1, Hp)  matmul dtype  -- linear_in(query), zero-padded features
    # h_ref:   (tM, Hp) native dtype  -- flattened hidden-state rows
    # s_ref:   (1, tM)  f32           -- lane-dense logits for this row tile
    h = h_ref[...]
    if h.dtype != qin_ref.dtype:                   # static check; usually a no-op
        h = h.astype(qin_ref.dtype)
    s_ref[...] = jax.lax.dot_general(
        qin_ref[...], h,
        dimension_numbers=(((1,), (1,)), ((), ())),
        preferred_element_type=jnp.float32)        # (1, tM)


# --------------------------------------------------------------------------- #
# Kernel 2: streaming output GEMM
#   out = h @ W2a + attn * (h @ W2b) + b_out
#   ==  [h, attn*h] @ W_out^T + b_out   (scale applied after the matmul)
# --------------------------------------------------------------------------- #
def _out_kernel(w2a_ref, w2b_ref, b_ref, h_ref, a_ref, o_ref):
    # w2a_ref/w2b_ref: (Hp, Hp) matmul dtype   b_ref: (1, Hp) f32
    # h_ref: (tM, Hp) native dtype   a_ref: (tM, 1) f32   o_ref: (tM, Hp)
    h = h_ref[...]
    if h.dtype != w2a_ref.dtype:
        h = h.astype(w2a_ref.dtype)
    hw_a = jnp.dot(h, w2a_ref[...], preferred_element_type=jnp.float32)
    hw_b = jnp.dot(h, w2b_ref[...], preferred_element_type=jnp.float32)
    o = hw_a + a_ref[...] * hw_b + b_ref[...]      # f32 accumulate throughout
    o_ref[...] = o.astype(o_ref.dtype)


# --------------------------------------------------------------------------- #
# Wrapper
# --------------------------------------------------------------------------- #
def masked_query_attention(query, hidden_states, mask, w_in, b_in, w_out, b_out,
                           *, use_bf16_matmul=False):
    """query: (H,), hidden_states: (B,S,H), mask: (B,S)
       w_in: (H,H), b_in: (H,), w_out: (H,2H), b_out: (H,)  (PyTorch layout)
       returns: (B, S, H) in hidden_states.dtype"""
    B, S, H = hidden_states.shape
    dt = hidden_states.dtype
    # Optional bf16 matmul path (numerics-affecting); default keeps native dtype.
    mm_dt = jnp.bfloat16 if use_bf16_matmul else dt

    # ---- grid-invariant linear_in, hoisted out of the kernels (f32) -------- #
    qin = (jnp.dot(query.astype(jnp.float32),
                   jnp.transpose(w_in).astype(jnp.float32))
           + b_in.astype(jnp.float32))                          # (H,)

    # ---- padded / flattened layout ----------------------------------------- #
    Hp = _round_up(H, 128)                    # lane-dense stores
    BS = B * S
    tM = min(512, _round_up(max(BS, 8), 8))   # rows per grid step (multiple of 8)
    BS_pad = _round_up(BS, tM)
    nt = BS_pad // tM

    h_flat = hidden_states.reshape(BS, H)
    if BS_pad != BS or Hp != H:
        h_flat = jnp.pad(h_flat, ((0, BS_pad - BS), (0, Hp - H)))

    qin_p = jnp.pad(qin, (0, Hp - H)).reshape(1, Hp).astype(mm_dt)

    dt_sz = jnp.dtype(dt).itemsize
    mm_sz = jnp.dtype(mm_dt).itemsize

    # ---- pass 1: attention logits (tiled Pallas GEMV) ----------------------- #
    score_bytes = 2 * (tM * Hp * dt_sz) + 2 * (Hp * mm_sz) + 4 * (tM * 4)
    scores_row = pl.pallas_call(
        _score_kernel,
        out_shape=jax.ShapeDtypeStruct((1, BS_pad), jnp.float32),
        grid_spec=pltpu.PrefetchScalarGridSpec(
            num_scalar_prefetch=0,
            grid=(nt,),
            in_specs=[
                pl.BlockSpec((1, Hp), lambda i: (0, 0)),      # qin (grid-invariant)
                pl.BlockSpec((tM, Hp), lambda i: (i, 0)),     # hidden rows
            ],
            out_specs=pl.BlockSpec((1, tM), lambda i: (0, i)),
        ),
        compiler_params=pltpu.CompilerParams(
            dimension_semantics=("parallel",),
            vmem_limit_bytes=_vmem_limit(score_bytes)),
    )(qin_p, h_flat)

    # ---- masked softmax over the sequence axis (tiny (B,S) op, wrapper) ----- #
    scores = scores_row[0, :BS].reshape(B, S)
    m = mask.astype(jnp.float32)
    # 1e-37 is a normal f32 (reference's 1e-45 would flush to a subnormal on TPU);
    # behaves identically for binary and soft masks, never produces NaN.
    logits = scores + jnp.log(m + jnp.float32(1e-37))
    attn = jax.nn.softmax(logits, axis=1)                       # (B, S) f32

    attn_col = jnp.pad(attn.reshape(BS), (0, BS_pad - BS)).reshape(BS_pad, 1)

    # ---- weights for the output GEMM: split W_out^T, zero-pad to (Hp, Hp) ---- #
    w_out_t = jnp.transpose(w_out)                              # (2H, H)
    w2a = jnp.pad(w_out_t[:H], ((0, Hp - H), (0, Hp - H))).astype(mm_dt)
    w2b = jnp.pad(w_out_t[H:], ((0, Hp - H), (0, Hp - H))).astype(mm_dt)
    b_out_p = jnp.pad(b_out.astype(jnp.float32), (0, Hp - H)).reshape(1, Hp)

    # ---- pass 2: streaming output GEMM -------------------------------------- #
    out_bytes = (2 * (tM * Hp * dt_sz)            # hidden rows (double-buffered)
                 + 2 * (tM * Hp * dt_sz)          # output rows
                 + 2 * (tM * 4)                   # attn column
                 + 2 * (2 * Hp * Hp * mm_sz)      # weights (worst case 2 buffers)
                 + 2 * (Hp * 4)                   # bias
                 + 3 * (tM * Hp * 4))             # f32 accumulators
    out_flat = pl.pallas_call(
        _out_kernel,
        out_shape=jax.ShapeDtypeStruct((BS_pad, Hp), dt),
        grid_spec=pltpu.PrefetchScalarGridSpec(
            num_scalar_prefetch=0,
            grid=(nt,),
            in_specs=[
                pl.BlockSpec((Hp, Hp), lambda i: (0, 0)),     # W2a (grid-invariant)
                pl.BlockSpec((Hp, Hp), lambda i: (0, 0)),     # W2b
                pl.BlockSpec((1, Hp), lambda i: (0, 0)),      # b_out
                pl.BlockSpec((tM, Hp), lambda i: (i, 0)),     # hidden rows
                pl.BlockSpec((tM, 1), lambda i: (i, 0)),      # attention column
            ],
            out_specs=pl.BlockSpec((tM, Hp), lambda i: (i, 0)),
        ),
        compiler_params=pltpu.CompilerParams(
            dimension_semantics=("parallel",),
            vmem_limit_bytes=_vmem_limit(out_bytes)),
    )(w2a, w2b, b_out_p, h_flat, attn_col)

    return out_flat[:BS, :H].reshape(B, S, H)


# --------------------------------------------------------------------------- #
# Pure-JAX reference mirroring the PyTorch forward
# --------------------------------------------------------------------------- #
def _reference(query, hidden_states, mask, w_in, b_in, w_out, b_out):
    q = query @ w_in.T + b_in                                   # (H,)
    score = jnp.einsum('bsh,h->bs', hidden_states, q)           # (B, S)
    m = mask.astype(jnp.float32)
    logits = score + jnp.log(m + jnp.float32(1e-45))
    attn = jax.nn.softmax(logits, axis=1)[..., None]            # (B, S, 1)
    scored = hidden_states * attn
    combined = jnp.concatenate([hidden_states, scored], axis=-1)
    return combined @ w_out.T + b_out


if __name__ == "__main__":
    B, S, H = 2, 8, 32
    key = jax.random.PRNGKey(0)
    k_q, k_hs, k_m, k_wi, k_bi, k_wo, k_bo = jax.random.split(key, 7)

    query = jax.random.normal(k_q, (H,), dtype=jnp.float32)
    hidden_states = jax.random.normal(k_hs, (B, S, H), dtype=jnp.float32)
    # binary mask with at least one valid position per row
    mask = (jax.random.uniform(k_m, (B, S)) > 0.3).astype(jnp.float32)
    mask = mask.at[:, 0].set(1.0)

    # Deterministic "Linear" parameters (PyTorch shapes: W_in (H,H), W_out (H,2H))
    bound_in = 1.0 / jnp.sqrt(H)
    bound_out = 1.0 / jnp.sqrt(2 * H)
    w_in = jax.random.uniform(k_wi, (H, H), minval=-bound_in, maxval=bound_in)
    b_in = jax.random.uniform(k_bi, (H,), minval=-bound_in, maxval=bound_in)
    w_out = jax.random.uniform(k_wo, (H, 2 * H), minval=-bound_out, maxval=bound_out)
    b_out = jax.random.uniform(k_bo, (H,), minval=-bound_out, maxval=bound_out)

    out = masked_query_attention(query, hidden_states, mask,
                                 w_in, b_in, w_out, b_out)
    out = jax.block_until_ready(out)

    ref = _reference(query, hidden_states, mask, w_in, b_in, w_out, b_out)
    assert out.shape == (B, S, H)
    assert out.dtype == hidden_states.dtype
    assert jnp.allclose(out, ref, rtol=1e-4, atol=1e-4), "mismatch vs reference"

    print("KERNEL_OK")
</pallas_src>

<mosaic_0001>
module attributes {stable_mosaic.version = 11 : i64} {
  func.func @_score_kernel(%arg0: i32, %arg1: memref<1x128xf32, #tpu.memory_space<vmem>>, %arg2: memref<16x128xf32, #tpu.memory_space<vmem>>, %arg3: memref<1x16xf32, #tpu.memory_space<vmem>>) attributes {dimension_semantics = [#tpu.dimension_semantics<parallel>], iteration_bounds = array<i64: 1>, scalar_prefetch = 0 : i64, scratch_operands = 0 : i64, tpu.core_type = #tpu.core_type<tc>, window_params = [{pipeline_mode = #tpu.pipeline_mode<synchronous>, transform_indices = @transform_0, window_bounds = array<i64: 1, 128>}, {transform_indices = @transform_1, window_bounds = array<i64: 16, 128>}, {transform_indices = @transform_2, window_bounds = array<i64: 1, 16>}]} {
    %c0 = arith.constant 0 : index
    %c0_0 = arith.constant 0 : index
    %0 = vector.load %arg2[%c0, %c0_0] : memref<16x128xf32, #tpu.memory_space<vmem>>, vector<16x128xf32>
    %c0_1 = arith.constant 0 : index
    %c0_2 = arith.constant 0 : index
    %1 = vector.load %arg1[%c0_1, %c0_2] : memref<1x128xf32, #tpu.memory_space<vmem>>, vector<1x128xf32>
    %cst = arith.constant dense<0.000000e+00> : vector<1x16xf32>
    %2 = tpu.matmul %1, %0, %cst {dimension_numbers = #tpu.dot_dimension_numbers<[1], [1], [0], [0], [0, 0, 1, 0], [], []>} : vector<1x128xf32>, vector<16x128xf32>, vector<1x16xf32> -> vector<1x16xf32>
    %c0_3 = arith.constant 0 : index
    %c0_4 = arith.constant 0 : index
    %3 = vector.load %arg3[%c0_3, %c0_4] : memref<1x16xf32, #tpu.memory_space<vmem>>, vector<1x16xf32>
    tpu.vector_store %arg3[%c0_3, %c0_4], %2 {strides = array<i32>} : memref<1x16xf32, #tpu.memory_space<vmem>>, vector<1x16xf32>,
    return
  }
  func.func @transform_0(%arg0: i32) -> (i32, i32) {
    %c0_i32 = arith.constant 0 : i32
    %c0_i32_0 = arith.constant 0 : i32
    %c0_i32_1 = arith.constant 0 : i32
    return %c0_i32, %c0_i32_0 : i32, i32
  }
  func.func @transform_1(%arg0: i32) -> (i32, i32) {
    %c0_i32 = arith.constant 0 : i32
    %c0_i32_0 = arith.constant 0 : i32
    return %arg0, %c0_i32 : i32, i32
  }
  func.func @transform_2(%arg0: i32) -> (i32, i32) {
    %c0_i32 = arith.constant 0 : i32
    %c0_i32_0 = arith.constant 0 : i32
    return %c0_i32, %arg0 : i32, i32
  }
}

</mosaic_0001>

<bundles_post_ra>
// kernel: tpu_custom_call.1
= control target key start
LH: loop header
LB: loop body
LE: loop exit
PB: predicated region body
PF: predicated region fallthrough
CT: control target
= control target key end

     0   :  { %7 = vsyncpa [#allocation3], 0  ;;  %s288_s0 = inlined_call_operand.hbm [shape: f32[1,128], index: 0, kind: input, shape index: {}]   ;;  %s289_s1 = inlined_call_operand.hbm [shape: f32[16,128], index: 1, kind: input, shape index: {}]   ;;  %s290_s2 = inlined_call_operand.hbm [shape: f32[1,16], index: 2, kind: output, shape index: {}]  }
   0x1   :  { %8 = vsyncpa [#allocation6], 0 }
   0x2   :  { %9 = vsyncpa [#allocation4], 0  ;;  %s222_s9 = smov [#allocation2]   ;;  %s223_s11 = smov [#allocation5]  }
   0x3   :  { %s16_s10 = sshll.u32 %s222_s9, 4  ;;  %s25_s12 = sshll.u32 %s223_s11, 4  ;;  %s17_s10 = int_to_ptr.vmem [resolvable:$true] %s16_s10  ;;  %s245_s12 = int_to_ptr.vmem [resolvable:$true] %s25_s12 }
   0x4   :  { %s150_s15 = scalar_lea.hbm %s288_s0, 16 }
   0x5   :  { %p151_p0 = scmp.ne.s32.totalorder %s288_s0, %s150_s15  ;;  %p154_p1 = scmp.lt.u32.totalorder %s150_s15, %s288_s0 }
   0x7   :  { %p156_p2 = pnand %p154_p1, %p151_p0 }
   0x9   :  { %159 = shalt.err (!%p156_p2)
}
   0xa   :  { %s160_s20 = scalar_lea.vmem %s17_s10, 16  ;;  %s164_s21 = scalar_lea.vmem %s17_s10, 32 }
   0xb   :  { %p161_p3 = scmp.ne.s32.totalorder %s17_s10, %s160_s20  ;;  %p165_p4 = scmp.lt.s32.totalorder %s17_s10, %s17_s10 }
   0xc   :  { %p166_p5 = scmp.lt.s32.totalorder %s164_s21, %s160_s20 }
   0xe   :  { %p167_p6 = por %p166_p5, %p165_p4 }
  0x10   :  { %p168_p7 = pnand %p167_p6, %p161_p3 }
  0x12   :  { %171 = shalt.err (!%p168_p7)
}
  0x13   :  { %19 = dma.hbm_to_vmem [thread:$0]  %s288_s0, 16, %s17_s10, [#allocation3]  }
  0x14   :  { %s172_s26 = scalar_lea.hbm %s289_s1, 256 }
  0x15   :  { %p173_p8 = scmp.ne.s32.totalorder %s289_s1, %s172_s26  ;;  %p176_p9 = scmp.lt.u32.totalorder %s172_s26, %s289_s1 }
  0x17   :  { %p178_p10 = pnand %p176_p9, %p173_p8 }
  0x19   :  { %181 = shalt.err (!%p178_p10)
}
  0x1a   :  { %s182_s3 = scalar_lea.vmem %s245_s12, 256  ;;  %p187_p12 = scmp.lt.s32.totalorder %s245_s12, %s245_s12 }
  0x1b   :  { %p183_p11 = scmp.ne.s32.totalorder %s245_s12, %s182_s3  ;;  %p188_p13 = scmp.lt.s32.totalorder %s182_s3, %s182_s3 }
  0x1d   :  { %p189_p0 = por %p188_p13, %p187_p12 }
  0x1f   :  { %p190_p1 = pnand %p189_p0, %p183_p11 }
  0x21   :  { %193 = shalt.err (!%p190_p1)
}
  0x22   :  { %s224_s0 = smov 128   ;;  %s225_s4 = smov 8  }
  0x23   :  { %31 = dma.hbm_to_vmem [thread:$0]  %s289_s1, 256, %s245_s12, [#allocation6], %s224_s0, %s224_s0, %s225_s4  }
  0x24   :  { %216 = dma.done.wait [#allocation3], 16  }
  0x25   :  { %217 = vsyncadd [#allocation3], 4294967280 }
  0x26   :  { %218 = dma.done.wait [#allocation6], 256  }
  0x27   :  { %219 = vsyncadd [#allocation6], 4294967040  ;;  %v226_v0 = vmov 0.0|0.0   ;;  %vm227_vm0 = vmmov 0   ;;  %v228_v1 = vmov 0.0   ;;  %v38_v2 = vld [vmem:[#allocation5] sm:$0xff] }
  0x28   :  { %139 = vmatprep.subr.bf16.mxu0 %v226_v0  ;;  %136 = vmatprep.mubr.msk.f32.mxu0 %vm227_vm0, %v228_v1  ;;  %v39_v3 = vld [vmem:[#allocation5 + $0x8] sm:$0xff]  ;;  %v40_v5 = vld [vmem:[#allocation2] sm:$0x1]  ;;  %s229_s7 = smov [#allocation7]   ;;  %vm111_vm1 = vcmask 122880  }
  0x29   :  { %v140_v4 = vpack.c.bf16 %v39_v3, %v38_v2  ;;  %s119_s8 = sshll.u32 %s229_s7, 4  ;;  %s120_s8 = int_to_ptr.vmem [resolvable:$true] %s119_s8 }
  0x2a   :  { %s194_s1 = scalar_lea.vmem %s120_s8, 16  ;;  %s198_s9 = scalar_lea.vmem %s120_s8, 32 }
  0x2b   :  { %141 = vmatpush3.bf16.xpose.msra.mxu0 %v140_v4  ;;  %p195_p2 = scmp.ne.s32.totalorder %s120_s8, %s194_s1  ;;  %p199_p3 = scmp.lt.s32.totalorder %s120_s8, %s120_s8 }
  0x2c   :  { %p200_p4 = scmp.lt.s32.totalorder %s198_s9, %s194_s1 }
  0x2e   :  { %p201_p5 = por %p200_p4, %p199_p3 }
  0x30   :  { %p202_p6 = pnand %p201_p5, %p195_p2 }
  0x32   :  { %137 = vmatmul.mubr.f32.vlgmr.msra.gmra.mrb[0].mxu0 %v40_v5 }
 0x105   :  { %v107_v6 = vpop.f32.mrb[0].mxu0 }
 0x106   :  { %v138_v7 = vpop.f32.mrb[1].mxu0  ;;  %112 = vst.msk [vmem:[#allocation7] sm:$0x1] %vm111_vm1, %v107_v6 }
 0x107   :  { %205 = shalt.err (!%p202_p6)
}
 0x108   :  { %s206_s12 = scalar_lea.hbm %s290_s2, 16 }
 0x109   :  { %p207_p7 = scmp.ne.s32.totalorder %s290_s2, %s206_s12  ;;  %p210_p8 = scmp.lt.u32.totalorder %s206_s12, %s290_s2 }
 0x10b   :  { %p212_p9 = pnand %p210_p8, %p207_p7 }
 0x10d   :  { %215 = shalt.err (!%p212_p9)
}
 0x10e   :  { %122 = dma.vmem_to_hbm [thread:$0]  %s120_s8, 16, %s290_s2, [#allocation4]  }
 0x10f   :  { %220 = dma.done.wait [#allocation4], 16  }
 0x110   :  { %221 = vsyncadd [#allocation4], 4294967280 }
 0x111   :  { %126 = vsyncpa [#allocation3], 1 }
 0x112   :  { %127 = vsyncpa [#allocation6], 1 }
 0x113   :  { %128 = vsyncpa [#allocation4], 1 }

</bundles_post_ra>
